<compile_context>
chip_gen: v7x
topology: tpu7x:2x2x1
jax: 0.10.0
libtpu: 0.0.40
codegen_flags: <defaults>
</compile_context>

<pallas_src>
import functools

import jax
import jax.numpy as jnp
from jax.experimental import pallas as pl
from jax.experimental.pallas import tpu as pltpu


def _round_up(x, m):
    return ((x + m - 1) // m) * m


def _matcher_kernel(qh_ref, k_ref, w2t_ref, wo_ref, out_ref,
                    *, tb, cp, cin, h, c_out):
    """One block of `tb` batch elements per grid step.

    qh_ref  : (tb, h)        hoisted relu(query @ W1^T) rows
    k_ref   : (tb, cp, cin)  candidate embeddings (Cin unpadded)
    w2t_ref : (cin, h)       W2^T (VMEM resident across grid steps)
    wo_ref  : (1, h)         out_linear weight (row vector)
    out_ref : (tb, c_out)    lane-dense per-candidate scores
    """
    # Candidate projection: ONE MXU matmul with M = tb * cp rows.
    # cp is a multiple of 8, so this reshape is layout-free (sublane merge).
    k2 = k_ref[...].reshape(tb * cp, cin)
    kh = jnp.maximum(
        jnp.dot(k2, w2t_ref[...], preferred_element_type=jnp.float32), 0.0)
    kh3 = kh.reshape(tb, cp, h)                                    # layout-free

    # tanh(query_hidden + key_hidden); broadcast qh over the candidate axis.
    cw = jnp.tanh(kh3 + qh_ref[...][:, None, :])                   # (tb, cp, h)

    # Final out_linear (no bias): contraction along the lane (hidden) axis.
    scores = jnp.sum(cw * wo_ref[...], axis=-1)                    # (tb, cp)

    # Lane-dense store: pad the candidate axis up to a 128-multiple and write
    # the full block (unmasked vst).  Padding lanes are zero and sliced off
    # in the wrapper.
    if c_out > cp:
        scores = jnp.concatenate(
            [scores, jnp.zeros((tb, c_out - cp), scores.dtype)], axis=-1)
    out_ref[...] = scores


def matcher_v2_forward(params, query, key):
    """MatcherV2.forward (inference; dropout = identity).

    query: (B, H) float32       -- current trajectory state
    key:   (B, C, Cin) float32  -- candidate embeddings
    returns: (B, C) float32 candidate weights
    """
    w1 = params["w1"]          # (H, H)    w1_linear.weight
    w2 = params["w2"]          # (H, Cin)  w2_linear.weight
    wo = params["out_w"]       # (1, H)    out_linear.weight

    B, H = query.shape
    _, C, Cin = key.shape
    f32 = jnp.float32

    # --- Hoisted query projection: one batched XLA matmul, not B MXU passes.
    qh = jnp.maximum(query.astype(f32) @ jnp.transpose(w1).astype(f32), 0.0)

    # --- Tiling choices.
    Cp = _round_up(C, 8)                 # sublane-aligned candidate count
    C_out = _round_up(Cp, 128)           # lane-dense output width

    # Fold enough batch elements per grid step that the matmul M >= ~256,
    # capped by (padded) batch size and a VMEM budget for the key block.
    m_target = 256
    tb = _round_up(max(1, -(-m_target // Cp)), 8)
    tb = min(tb, _round_up(B, 8))
    bytes_per_b = 4 * (Cp * Cin + H + C_out)
    tb_vmem_cap = max(8, ((8 << 20) // max(bytes_per_b, 1)) // 8 * 8)
    tb = max(8, min(tb, tb_vmem_cap))
    Bp = _round_up(B, tb)

    # --- Padding (zero padding is exact):
    #  * padded batch rows: qh = 0, key = 0 -> score 0, sliced off;
    #  * padded candidate rows: finite garbage scores, sliced off;
    #  * Cin and H are NOT padded (full-array-dim block exception).
    qh_p = jnp.zeros((Bp, H), f32).at[:B].set(qh)
    if (Bp, Cp) == (B, C):
        key_p = key.astype(f32)
    else:
        key_p = jnp.zeros((Bp, Cp, Cin), f32).at[:B, :C].set(key.astype(f32))
    w2t = jnp.transpose(w2).astype(f32)            # (Cin, H)
    wo_row = wo.astype(f32).reshape(1, H)          # (1, H)

    # --- Scheduling hints.
    flops = int(Bp * Cp * (2 * Cin * H + 4 * H))
    transcendentals = int(Bp * Cp * H)
    bytes_accessed = int(4 * (Bp * Cp * Cin + Bp * H + Cin * H + H
                              + Bp * C_out))

    per_step_io = 4 * tb * (Cp * Cin + H + C_out)          # double-buffered
    per_step_tmp = 2 * 4 * tb * Cp * H                     # kh / cw temps
    resident = 4 * (Cin * H + H)
    vmem_limit = int(min(max(4 * per_step_io + per_step_tmp + 2 * resident
                             + (8 << 20), 16 << 20), 56 << 20))

    kernel = functools.partial(_matcher_kernel, tb=tb, cp=Cp, cin=Cin,
                               h=H, c_out=C_out)

    out_padded = pl.pallas_call(
        kernel,
        out_shape=jax.ShapeDtypeStruct((Bp, C_out), f32),
        grid=(Bp // tb,),
        in_specs=[
            pl.BlockSpec((tb, H), lambda b: (b, 0)),          # qh (hoisted)
            pl.BlockSpec((tb, Cp, Cin), lambda b: (b, 0, 0)), # key, Cin unpadded
            pl.BlockSpec((Cin, H), lambda b: (0, 0)),         # W2^T (resident)
            pl.BlockSpec((1, H), lambda b: (0, 0)),           # w_out (resident)
        ],
        out_specs=pl.BlockSpec((tb, C_out), lambda b: (b, 0)),
        compiler_params=pltpu.CompilerParams(
            dimension_semantics=("parallel",),
            vmem_limit_bytes=vmem_limit),
        cost_estimate=pl.CostEstimate(
            flops=flops,
            transcendentals=transcendentals,
            bytes_accessed=bytes_accessed),
    )(qh_p, key_p, w2t, wo_row)

    return out_padded[:B, :C]


def _reference_forward(params, query, key):
    """Pure-JAX reference replicating the PyTorch MatcherV2 forward."""
    qh = jnp.maximum(query @ params["w1"].T, 0.0)                        # (B, H)
    kh = jnp.maximum(jnp.einsum("bci,hi->bch", key, params["w2"]), 0.0)  # (B, C, H)
    cw = jnp.tanh(qh[:, None, :] + kh)                                   # (B, C, H)
    return jnp.einsum("bch,oh->bco", cw, params["out_w"])[..., 0]        # (B, C)


def init_params(key, hidden_size, candidate_input_size):
    k1, k2, k3 = jax.random.split(key, 3)
    s_h = 1.0 / jnp.sqrt(hidden_size)
    s_c = 1.0 / jnp.sqrt(candidate_input_size)
    return {
        # PyTorch nn.Linear weight layout: (out_features, in_features)
        "w1": s_h * jax.random.normal(k1, (hidden_size, hidden_size), jnp.float32),
        "w2": s_c * jax.random.normal(k2, (hidden_size, candidate_input_size),
                                      jnp.float32),
        "out_w": s_h * jax.random.normal(k3, (1, hidden_size), jnp.float32),
    }


if __name__ == "__main__":
    # Small deterministic config consistent with the module:
    #   batch=2, candidate_size=8, hidden_size=32, candidate_input_size=16
    B, C, H, Cin = 2, 8, 32, 16

    root = jax.random.PRNGKey(0)
    kp, kq, kk = jax.random.split(root, 3)

    params = init_params(kp, H, Cin)
    query = jax.random.normal(kq, (B, H), jnp.float32)
    cand_key = jax.random.normal(kk, (B, C, Cin), jnp.float32)

    fwd = jax.jit(matcher_v2_forward)
    out = jax.block_until_ready(fwd(params, query, cand_key))
    ref = jax.block_until_ready(_reference_forward(params, query, cand_key))

    assert out.shape == (B, C)
    assert bool(jnp.allclose(out, ref, atol=1e-4, rtol=1e-4)), (out, ref)

    print("KERNEL_OK")
</pallas_src>

<mosaic_0001>
module attributes {stable_mosaic.version = 11 : i64} {
  func.func @_matcher_kernel(%arg0: i32, %arg1: memref<8x32xf32, #tpu.memory_space<vmem>>, %arg2: memref<8x8x16xf32, #tpu.memory_space<vmem>>, %arg3: memref<16x32xf32, #tpu.memory_space<vmem>>, %arg4: memref<1x32xf32, #tpu.memory_space<vmem>>, %arg5: memref<8x128xf32, #tpu.memory_space<vmem>>) attributes {dimension_semantics = [#tpu.dimension_semantics<parallel>], iteration_bounds = array<i64: 1>, scalar_prefetch = 0 : i64, scratch_operands = 0 : i64, tpu.core_type = #tpu.core_type<tc>, window_params = [{transform_indices = @transform_0, window_bounds = array<i64: 8, 32>}, {transform_indices = @transform_1, window_bounds = array<i64: 8, 8, 16>}, {pipeline_mode = #tpu.pipeline_mode<synchronous>, transform_indices = @transform_2, window_bounds = array<i64: 16, 32>}, {pipeline_mode = #tpu.pipeline_mode<synchronous>, transform_indices = @transform_3, window_bounds = array<i64: 1, 32>}, {transform_indices = @transform_4, window_bounds = array<i64: 8, 128>}]} {
    %c0 = arith.constant 0 : index
    %c0_0 = arith.constant 0 : index
    %c0_1 = arith.constant 0 : index
    %0 = vector.load %arg2[%c0, %c0_0, %c0_1] : memref<8x8x16xf32, #tpu.memory_space<vmem>>, vector<8x8x16xf32>
    %1 = vector.shape_cast %0 : vector<8x8x16xf32> to vector<64x16xf32>
    %c0_2 = arith.constant 0 : index
    %c0_3 = arith.constant 0 : index
    %2 = vector.load %arg3[%c0_2, %c0_3] : memref<16x32xf32, #tpu.memory_space<vmem>>, vector<16x32xf32>
    %cst = arith.constant dense<0.000000e+00> : vector<64x32xf32>
    %3 = tpu.matmul %1, %2, %cst {dimension_numbers = #tpu.dot_dimension_numbers<[1], [0], [0], [1], [0, 0, 1, 1], [], []>} : vector<64x16xf32>, vector<16x32xf32>, vector<64x32xf32> -> vector<64x32xf32>
    %cst_4 = arith.constant 0.000000e+00 : f32
    %4 = vector.broadcast %cst_4 : f32 to vector<64x32xf32>
    %5 = arith.maximumf %3, %4 : vector<64x32xf32>
    %6 = vector.shape_cast %5 : vector<64x32xf32> to vector<8x8x32xf32>
    %c0_5 = arith.constant 0 : index
    %c0_6 = arith.constant 0 : index
    %7 = vector.load %arg1[%c0_5, %c0_6] : memref<8x32xf32, #tpu.memory_space<vmem>>, vector<8x32xf32>
    %8 = vector.shape_cast %7 : vector<8x32xf32> to vector<8x1x32xf32>
    %9 = vector.broadcast %8 : vector<8x1x32xf32> to vector<8x8x32xf32>
    %10 = arith.addf %6, %9 : vector<8x8x32xf32>
    %11 = math.tanh %10 : vector<8x8x32xf32>
    %c0_7 = arith.constant 0 : index
    %c0_8 = arith.constant 0 : index
    %12 = vector.load %arg4[%c0_7, %c0_8] : memref<1x32xf32, #tpu.memory_space<vmem>>, vector<1x32xf32>
    %13 = vector.shape_cast %12 : vector<1x32xf32> to vector<1x1x32xf32>
    %14 = vector.broadcast %13 : vector<1x1x32xf32> to vector<8x8x32xf32>
    %15 = arith.mulf %11, %14 : vector<8x8x32xf32>
    %cst_9 = arith.constant dense<0.000000e+00> : vector<8x8xf32>
    %16 = vector.multi_reduction <add>, %15, %cst_9 [2] : vector<8x8x32xf32> to vector<8x8xf32>
    %cst_10 = arith.constant 0.000000e+00 : f32
    %17 = vector.broadcast %cst_10 : f32 to vector<8x120xf32>
    %18 = tpu.concatenate %16, %17 in 1 : vector<8x8xf32>, vector<8x120xf32> -> vector<8x128xf32>
    %c0_11 = arith.constant 0 : index
    %c0_12 = arith.constant 0 : index
    %19 = vector.load %arg5[%c0_11, %c0_12] : memref<8x128xf32, #tpu.memory_space<vmem>>, vector<8x128xf32>
    tpu.vector_store %arg5[%c0_11, %c0_12], %18 {strides = array<i32>} : memref<8x128xf32, #tpu.memory_space<vmem>>, vector<8x128xf32>,
    return
  }
  func.func @transform_0(%arg0: i32) -> (i32, i32) {
    %c0_i32 = arith.constant 0 : i32
    %c0_i32_0 = arith.constant 0 : i32
    return %arg0, %c0_i32 : i32, i32
  }
  func.func @transform_1(%arg0: i32) -> (i32, i32, i32) {
    %c0_i32 = arith.constant 0 : i32
    %c0_i32_0 = arith.constant 0 : i32
    %c0_i32_1 = arith.constant 0 : i32
    return %arg0, %c0_i32, %c0_i32_0 : i32, i32, i32
  }
  func.func @transform_2(%arg0: i32) -> (i32, i32) {
    %c0_i32 = arith.constant 0 : i32
    %c0_i32_0 = arith.constant 0 : i32
    %c0_i32_1 = arith.constant 0 : i32
    return %c0_i32, %c0_i32_0 : i32, i32
  }
  func.func @transform_3(%arg0: i32) -> (i32, i32) {
    %c0_i32 = arith.constant 0 : i32
    %c0_i32_0 = arith.constant 0 : i32
    %c0_i32_1 = arith.constant 0 : i32
    return %c0_i32, %c0_i32_0 : i32, i32
  }
  func.func @transform_4(%arg0: i32) -> (i32, i32) {
    %c0_i32 = arith.constant 0 : i32
    %c0_i32_0 = arith.constant 0 : i32
    return %arg0, %c0_i32 : i32, i32
  }
}

</mosaic_0001>

<bundles_post_ra>
// kernel: matcher_v2_forward.1
= control target key start
LH: loop header
LB: loop body
LE: loop exit
PB: predicated region body
PF: predicated region fallthrough
CT: control target
= control target key end

     0   :  { %vm27_vm0 = vcmask 130048   ;;  %v171_v11 = vlaneseq  ;;  %v435_v15 = vmov 1966171168   ;;  %vm287_vm1 = vcmask 261120   ;;  %s526_s2 = inlined_call_operand.vmem [shape: f32[16,32], index: 2, kind: input, shape index: {}]   ;;  %s527_s1 = inlined_call_operand.vmem [shape: f32[8,8,16], index: 1, kind: input, shape index: {}]   ;;  %s528_s0 = inlined_call_operand.vmem [shape: f32[8,32], index: 0, kind: input, shape index: {}]   ;;  %s529_s3 = inlined_call_operand.vmem [shape: f32[1,32], index: 3, kind: input, shape index: {}]   ;;  %s530_s4 = inlined_call_operand.vmem [shape: f32[8,128], index: 4, kind: output, shape index: {}]  }
   0x1   :  { %v25_v0 = vld [vmem:[%s526_s2] sm:$0xff]  ;;  %v26_v1 = vld [vmem:[%s526_s2 + $0x8] sm:$0xff]  ;;  %v19_v7 = vld [vmem:[%s527_s1 + $0x10] sm:$0xff]  ;;  %v169_v16 = vunpack.c.l.s4 %v435_v15  ;;  %vm354_vm2 = vcmask 1041409   ;;  %vm356_vm3 = vcmask 1042434   ;;  %vm358_vm4 = vcmask 1043459  }
   0x2   :  { %v17_v2 = vld [vmem:[%s527_s1] sm:$0xff]  ;;  %v411_v3 = vpack.c.bf16 %v26_v1, %v25_v0  ;;  %v18_v5 = vld [vmem:[%s527_s1 + $0x8] sm:$0xff]  ;;  %v23_v8 = vld [vmem:[%s527_s1 + $0x30] sm:$0xff]  ;;  %v321_v12 = vand.u32 127, %v171_v11  ;;  %v172_v13 = vshrl.u32 %v171_v11, 7  ;;  %vm360_vm5 = vcmask 1044484  }
   0x3   :  { %399 = vmatprep.mubr.msk.f32.mxu0 %vm27_vm0, %v17_v2  ;;  %v21_v4 = vld [vmem:[%s527_s1 + $0x20] sm:$0xff]  ;;  %v22_v6 = vld [vmem:[%s527_s1 + $0x28] sm:$0xff]  ;;  %v20_v9 = vld [vmem:[%s527_s1 + $0x18] sm:$0xff]  ;;  %v170_v17 = vunpack.c.0.s8 %v169_v16  ;;  %vm362_vm6 = vcmask 1045509   ;;  %vm364_vm7 = vcmask 1046534   ;;  %vm366_vm8 = vcmask 1047559  }
   0x4   :  { %412 = vmatprep.subr.bf16.mxu0 %v411_v3  ;;  %415 = vmatprep.subr.bf16.mxu1 %v411_v3  ;;  %v24_v10 = vld [vmem:[%s527_s1 + $0x38] sm:$0xff]  ;;  %v499_v14 = vsub.s32 %v321_v12, %v172_v13  ;;  %v165_v19 = vld [vmem:[%s528_s0] sm:$0xff]  ;;  %v218_v25 = vsub.s32 0, %v172_v13  ;;  %vm369_vm9 = vcmask 64512  }
   0x5   :  { %414 = vmatpush3.bf16.msra.mxu0 %v411_v3  ;;  %416 = vmatpush3.bf16.msra.mxu1 %v411_v3  ;;  %v173_v18 = vsub.s32 %v170_v17, %v172_v13  ;;  %v167_v21 = vcombine.high %v165_v19, %v165_v19  ;;  %v384_v2 = vld [vmem:[%s529_s3] ss:$0 sm:$0xff] }
   0x6   :  { %405 = vmatprep.mubr.msk.f32.mxu1 %vm27_vm0, %v21_v4 }
   0x7   :  { %v174_v20 = vrot.slane %v165_v19, %v173_v18  ;;  %v181_v23 = vrot.slane %v167_v21, %v173_v18 }
   0x8   :  { %400 = vmatmul.mubr.msk.f32.vlgmr.msra.gmra.mrb[0].mxu0 %vm27_vm0, %v18_v5  ;;  %406 = vmatmul.mubr.msk.f32.vlgmr.msra.gmra.mrb[0].mxu1 %vm27_vm0, %v22_v6 }
   0x9   :  { %402 = vmatprep.mubr.msk.f32.mxu0 %vm27_vm0, %v19_v7  ;;  %408 = vmatprep.mubr.msk.f32.mxu1 %vm27_vm0, %v23_v8  ;;  %v182_v22 = vcombine.high %v174_v20, %v174_v20  ;;  %v190_v26 = vrot.slane %v174_v20, %v173_v18  ;;  %v183_v27 = vcombine.high %v181_v23, %v181_v23 }
   0xa   :  { %v197_v28 = vrot.slane %v181_v23, %v173_v18 }
   0xb   :  { %v204_v24 = vrot.slane %v182_v22, %v173_v18  ;;  %v212_v31 = vcombine.high %v190_v26, %v190_v26  ;;  %v219_v33 = vrot.slane %v190_v26, %v218_v25  ;;  %v211_v35 = vrot.slane %v183_v27, %v173_v18 }
   0xc   :  { %403 = vmatmul.mubr.msk.f32.gmra.mrb[2].mxu0 %vm27_vm0, %v20_v9  ;;  %409 = vmatmul.mubr.msk.f32.gmra.mrb[2].mxu1 %vm27_vm0, %v24_v10  ;;  %v235_v36 = vrot.slane %v197_v28, %v218_v25  ;;  %v213_v37 = vcombine.high %v197_v28, %v197_v28 }
   0xd   :  { %v223_v29 = vrot.slane %v204_v24, %v218_v25  ;;  %v214_v30 = vcombine.high %v204_v24, %v204_v24  ;;  %v227_v45 = vrot.slane %v212_v31, %v218_v25  ;;  %v239_v48 = vrot.slane %v211_v35, %v218_v25 }
   0xe   :  { %v243_v51 = vrot.slane %v213_v37, %v218_v25  ;;  %v215_v55 = vcombine.high %v211_v35, %v211_v35 }
   0xf   :  { %v231_v44 = vrot.slane %v214_v30, %v218_v25 }
  0x10   :  { %v247_v0 = vrot.slane %v215_v55, %v218_v25 }
  0xdb   :  { %v401_v32 = vpop.f32.mrb[0].mxu0  ;;  %v407_v34 = vpop.f32.mrb[0].mxu1 }
  0xdc   :  { %v158_v38 = vmax.f32 %v401_v32, 0.0  ;;  %v118_v39 = vpop.f32.mrb[1].mxu0  ;;  %v138_v40 = vpop.f32.mrb[1].mxu1  ;;  %v162_v54 = vmax.f32 %v407_v34, 0.0 }
  0xdd   :  { %v157_v41 = vmax.f32 %v118_v39, 0.0  ;;  %v161_v42 = vmax.f32 %v138_v40, 0.0 }
  0xde   :  { %v257_v43 = vadd.f32 %v223_v29, %v158_v38  ;;  %v261_v62 = vadd.f32 %v239_v48, %v162_v54 }
  0xdf   :  { %v256_v46 = vadd.f32 %v219_v33, %v157_v41  ;;  %v404_v47 = vpop.f32.mrb[2].mxu0  ;;  %v260_v49 = vadd.f32 %v235_v36, %v161_v42  ;;  %v410_v50 = vpop.f32.mrb[2].mxu1 }
  0xe0   :  { %419 = vtanh.f32 %v257_v43  ;;  %v160_v52 = vmax.f32 %v404_v47, 0.0  ;;  %v128_v53 = vpop.f32.mrb[3].mxu0  ;;  %v148_v56 = vpop.f32.mrb[3].mxu1  ;;  %v164_v63 = vmax.f32 %v410_v50, 0.0 }
  0xe1   :  { %421 = vtanh.f32 %v256_v46  ;;  %v159_v57 = vmax.f32 %v128_v53, 0.0  ;;  %v163_v58 = vmax.f32 %v148_v56, 0.0 }
  0xe2   :  { %v259_v59 = vadd.f32 %v231_v44, %v160_v52  ;;  %423 = vtanh.f32 %v260_v49  ;;  %v263_v1 = vadd.f32 %v247_v0, %v164_v63 }
  0xe3   :  { %v258_v60 = vadd.f32 %v227_v45, %v159_v57  ;;  %v262_v61 = vadd.f32 %v243_v51, %v163_v58 }
  0xe4   :  { %425 = vtanh.f32 %v259_v59 }
  0xe5   :  { %427 = vtanh.f32 %v258_v60 }
  0xe6   :  { %429 = vtanh.f32 %v262_v61 }
  0xe7   :  { %431 = vtanh.f32 %v261_v62 }
  0xe8   :  { %433 = vtanh.f32 %v263_v1 }
  0xea   :  { %v420_v3 = vpop.eup %419 }
  0xeb   :  { %v422_v4 = vpop.eup %421  ;;  %v280_v5 = vmul.f32 %v420_v3, %v384_v2 }
  0xec   :  { %v424_v6 = vpop.eup %423  ;;  %v279_v8 = vmul.f32 %v422_v4, %v384_v2 }
  0xed   :  { %v291_v7 = vsel %vm287_vm1, %v280_v5, 0.0  ;;  %v283_v12 = vmul.f32 %v424_v6, %v384_v2 }
  0xee   :  { %v426_v9 = vpop.eup %425  ;;  %292 = vadd.xlane.f32.xlu0 %v291_v7  ;;  %v288_v15 = vsel %vm287_vm1, %v279_v8, 0.0 }
  0xef   :  { %v428_v10 = vpop.eup %427  ;;  %v282_v11 = vmul.f32 %v426_v9, %v384_v2  ;;  %v300_v19 = vsel %vm287_vm1, %v283_v12, 0.0 }
  0xf0   :  { %v430_v13 = vpop.eup %429  ;;  %v281_v17 = vmul.f32 %v428_v10, %v384_v2 }
  0xf1   :  { %v297_v16 = vsel %vm287_vm1, %v282_v11, 0.0  ;;  %v432_v18 = vpop.eup %431  ;;  %v285_v20 = vmul.f32 %v430_v13, %v384_v2 }
  0xf2   :  { %289 = vadd.xlane.f32.xlu0 %v288_v15  ;;  %298 = vadd.xlane.f32.xlu1 %v297_v16  ;;  %v294_v21 = vsel %vm287_vm1, %v281_v17, 0.0  ;;  %v284_v22 = vmul.f32 %v432_v18, %v384_v2  ;;  %v434_v23 = vpop.eup %433 }
  0xf3   :  { %v306_v24 = vsel %vm287_vm1, %v285_v20, 0.0  ;;  %v286_v26 = vmul.f32 %v434_v23, %v384_v2 }
  0xf4   :  { %v303_v25 = vsel %vm287_vm1, %v284_v22, 0.0 }
  0xf5   :  { %v309_v27 = vsel %vm287_vm1, %v286_v26, 0.0 }
  0xf6   :  { %295 = vadd.xlane.f32.xlu1 %v294_v21  ;;  %301 = vadd.xlane.f32.xlu0 %v300_v19 }
  0xfa   :  { %304 = vadd.xlane.f32.xlu1 %v303_v25  ;;  %307 = vadd.xlane.f32.xlu0 %v306_v24 }
  0xfe   :  { %310 = vadd.xlane.f32.xlu1 %v309_v27 }
 0x17b   :  { %v293_v28 = vpop.xlane.xlu0 %292 }
 0x17c   :  { %v329_v32 = vrot.slane %v293_v28, %v499_v14 }
 0x17f   :  { %v290_v29 = vpop.xlane.xlu0 %289  ;;  %v299_v30 = vpop.xlane.xlu1 %298 }
 0x180   :  { %v325_v31 = vrot.slane %v290_v29, %v499_v14  ;;  %v337_v38 = vrot.slane %v299_v30, %v499_v14 }
 0x182   :  { %v355_v37 = vsel %vm354_vm2, %v329_v32, %v325_v31 }
 0x183   :  { %v296_v33 = vpop.xlane.xlu1 %295  ;;  %v302_v34 = vpop.xlane.xlu0 %301 }
 0x184   :  { %v333_v35 = vrot.slane %v296_v33, %v499_v14  ;;  %v341_v36 = vrot.slane %v302_v34, %v499_v14 }
 0x186   :  { %v357_v39 = vsel %vm356_vm3, %v333_v35, %v355_v37 }
 0x187   :  { %v359_v40 = vsel %vm358_vm4, %v337_v38, %v357_v39  ;;  %v305_v41 = vpop.xlane.xlu1 %304  ;;  %v308_v42 = vpop.xlane.xlu0 %307 }
 0x188   :  { %v361_v43 = vsel %vm360_vm5, %v341_v36, %v359_v40  ;;  %v345_v44 = vrot.slane %v305_v41, %v499_v14  ;;  %v349_v45 = vrot.slane %v308_v42, %v499_v14 }
 0x18a   :  { %v363_v46 = vsel %vm362_vm6, %v345_v44, %v361_v43 }
 0x18b   :  { %v311_v47 = vpop.xlane.xlu1 %310  ;;  %v365_v49 = vsel %vm364_vm7, %v349_v45, %v363_v46 }
 0x18c   :  { %v353_v48 = vrot.slane %v311_v47, %v499_v14 }
 0x18e   :  { %v367_v50 = vsel %vm366_vm8, %v353_v48, %v365_v49 }
 0x18f   :  { %v370_v51 = vsel %vm369_vm9, %v367_v50, 0.0 }
 0x190   :  { %371 = vst [vmem:[%s530_s4] sm:$0xff] %v370_v51 }

</bundles_post_ra>
